<compile_context>
chip_gen: v6e
topology: v6e:2x2x1
jax: 0.10.0
libtpu: 0.0.40
codegen_flags: <defaults>
</compile_context>

<pallas_src>
import jax
import jax.numpy as jnp
from jax.experimental import pallas as pl
from jax.experimental.pallas import tpu as pltpu

WEEKDAYS_COUNT = 7


# ---------------------------------------------------------------------------
# Kernel
# ---------------------------------------------------------------------------
def _regressor_kernel(x_ref, w1_ref, b1_ref, w2_ref, b2_ref, o_ref):
    # Folded Linear1 over the concatenated (bf16) input; accumulate in f32.
    h = jnp.dot(x_ref[...], w1_ref[...], preferred_element_type=jnp.float32)
    h = h + b1_ref[...]

    # Sigmoid: exp on EUP, approx reciprocal also on EUP (free slot).
    h = pl.reciprocal(1.0 + jnp.exp(-h), approx=True)

    # Linear2 (tiny f32 matmul, fully hidden under the input DMA).
    y = jnp.dot(h, w2_ref[...], preferred_element_type=jnp.float32) + b2_ref[...]

    # LeakyReLU(negative_slope=1e-4)
    o_ref[...] = jnp.where(y >= 0.0, y, 1e-4 * y)


def _round_up(x, m):
    return (x + m - 1) // m * m


# ---------------------------------------------------------------------------
# Wrapper
# ---------------------------------------------------------------------------
def delivery_timeframe_regressor(folded, xw, xc, xt, *, tile_b=4096):
    """Forward pass using folded parameters (see fold_params)."""
    B = xw.shape[0]

    # Concatenate + cast once in the wrapper (fuses in XLA); one-hot-style
    # encodings are exact in bf16.
    x = jnp.concatenate([xw, xc, xt], axis=1).astype(jnp.bfloat16)
    K = x.shape[1]

    w1 = folded["w1_folded"]   # (K, H) bf16
    b1 = folded["b1_folded"]   # (1, H) f32
    w2 = folded["w2"]          # (H, 2) f32
    b2 = folded["b2"]          # (1, 2) f32
    H = w1.shape[1]

    # Batch tiling: pad B to a multiple of the tile so every block is full.
    tile_b = min(tile_b, _round_up(B, 8))
    padded_b = _round_up(B, tile_b)
    if padded_b != B:
        x = jnp.pad(x, ((0, padded_b - B), (0, 0)))
    grid = (padded_b // tile_b,)

    flops = 2 * padded_b * (K * H + H * 2)
    bytes_accessed = (padded_b * K * 2            # bf16 input read
                      + padded_b * 2 * 4          # f32 output write
                      + w1.size * 2
                      + (b1.size + w2.size + b2.size) * 4)

    out = pl.pallas_call(
        _regressor_kernel,
        out_shape=jax.ShapeDtypeStruct((padded_b, 2), jnp.float32),
        grid=grid,
        in_specs=[
            pl.BlockSpec((tile_b, K), lambda i: (i, 0)),   # batch-tiled input
            pl.BlockSpec((K, H), lambda i: (0, 0)),        # resident weights
            pl.BlockSpec((1, H), lambda i: (0, 0)),
            pl.BlockSpec((H, 2), lambda i: (0, 0)),
            pl.BlockSpec((1, 2), lambda i: (0, 0)),
        ],
        out_specs=pl.BlockSpec((tile_b, 2), lambda i: (i, 0)),
        compiler_params=pltpu.CompilerParams(
            dimension_semantics=("parallel",),         # megacore / 2-TC shard
            vmem_limit_bytes=32 * 1024 * 1024,         # safe on v5e/v6e/v7x
        ),
        cost_estimate=pl.CostEstimate(
            flops=flops,
            transcendentals=padded_b * H,
            bytes_accessed=bytes_accessed,
        ),
    )(x, w1, b1, w2, b2)

    return out[:B]


# ---------------------------------------------------------------------------
# Parameter construction
# ---------------------------------------------------------------------------
def init_params(key, cities_count, transporters_count):
    """Deterministic init mimicking PyTorch nn.Linear (uniform +-1/sqrt(fan_in)).
    Weights are stored transposed: (in_features, out_features)."""
    C, T = cities_count, transporters_count
    concat = WEEKDAYS_COUNT + C + T
    H = concat // 2

    def linear(key, fan_in, fan_out):
        kw, kb = jax.random.split(key)
        bound = 1.0 / jnp.sqrt(jnp.float32(fan_in))
        w = jax.random.uniform(kw, (fan_in, fan_out), jnp.float32, -bound, bound)
        b = jax.random.uniform(kb, (1, fan_out), jnp.float32, -bound, bound)
        return w, b

    keys = jax.random.split(key, 5)
    wew, bew = linear(keys[0], WEEKDAYS_COUNT, WEEKDAYS_COUNT)
    wec, bec = linear(keys[1], C, C)
    wet, bet = linear(keys[2], T, T)
    w1, b1 = linear(keys[3], concat, H)
    w2, b2 = linear(keys[4], H, 2)

    # Split Linear1 weight rows to match the [weekday | city | transporter] concat.
    w1w = w1[:WEEKDAYS_COUNT]
    w1c = w1[WEEKDAYS_COUNT:WEEKDAYS_COUNT + C]
    w1t = w1[WEEKDAYS_COUNT + C:]

    return dict(wew=wew, bew=bew, wec=wec, bec=bec, wet=wet, bet=bet,
                w1w=w1w, w1c=w1c, w1t=w1t, b1=b1, w2=w2, b2=b2)


def fold_params(p):
    """One-time offline fold: embedding Linears absorbed into Linear1.

    h = sigmoid( [xw@Wew+bew | xc@Wec+bec | xt@Wet+bet] @ W1 + b1 )
      = sigmoid( xw@(Wew@W1w) + xc@(Wec@W1c) + xt@(Wet@W1t)
                 + (bew@W1w + bec@W1c + bet@W1t + b1) )
    """
    w1_folded = jnp.concatenate(
        [p["wew"] @ p["w1w"], p["wec"] @ p["w1c"], p["wet"] @ p["w1t"]], axis=0)
    b1_folded = p["bew"] @ p["w1w"] + p["bec"] @ p["w1c"] + p["bet"] @ p["w1t"] + p["b1"]
    return dict(
        w1_folded=w1_folded.astype(jnp.bfloat16),   # bf16 storage, f32 accumulate
        b1_folded=b1_folded.astype(jnp.float32),
        w2=p["w2"].astype(jnp.float32),
        b2=p["b2"].astype(jnp.float32),
    )


def reference_forward(params, xw, xc, xt):
    """Pure-JAX f32 reference mirroring the PyTorch forward (unfolded)."""
    ew = xw @ params["wew"] + params["bew"]
    ec = xc @ params["wec"] + params["bec"]
    et = xt @ params["wet"] + params["bet"]
    x = jnp.concatenate([ew, ec, et], axis=1)
    w1 = jnp.concatenate([params["w1w"], params["w1c"], params["w1t"]], axis=0)
    h = jax.nn.sigmoid(x @ w1 + params["b1"])
    y = h @ params["w2"] + params["b2"]
    return jnp.where(y >= 0.0, y, 1e-4 * y)


# ---------------------------------------------------------------------------
# Demo / self-test
# ---------------------------------------------------------------------------
if __name__ == "__main__":
    cities_count = 10
    transporters_count = 5

    key = jax.random.PRNGKey(0)
    kp, k1, k2, k3 = jax.random.split(key, 4)

    params = init_params(kp, cities_count, transporters_count)
    folded = fold_params(params)

    def make_inputs(kw, kc, kt, batch):
        xw = jax.nn.one_hot(
            jax.random.randint(kw, (batch,), 0, WEEKDAYS_COUNT),
            WEEKDAYS_COUNT, dtype=jnp.float32)
        xc = jax.nn.one_hot(
            jax.random.randint(kc, (batch,), 0, cities_count),
            cities_count, dtype=jnp.float32)
        xt = jax.nn.one_hot(
            jax.random.randint(kt, (batch,), 0, transporters_count),
            transporters_count, dtype=jnp.float32)
        return xw, xc, xt

    # --- small demo batch (matches the original spec example) ---------------
    batch = 2
    xw, xc, xt = make_inputs(k1, k2, k3, batch)
    out = delivery_timeframe_regressor(folded, xw, xc, xt)
    out = jax.block_until_ready(out)
    ref = reference_forward(params, xw, xc, xt)
    assert out.shape == (batch, 2)
    # bf16 weight storage + offline folding => compare at bf16-level tolerance.
    assert jnp.allclose(out, ref, atol=1e-2, rtol=1e-2)

    # --- multi-block grid + padding path (still small) -----------------------
    batch2 = 300
    xw2, xc2, xt2 = make_inputs(k3, k1, k2, batch2)
    out2 = delivery_timeframe_regressor(folded, xw2, xc2, xt2, tile_b=128)
    out2 = jax.block_until_ready(out2)
    ref2 = reference_forward(params, xw2, xc2, xt2)
    assert out2.shape == (batch2, 2)
    assert jnp.allclose(out2, ref2, atol=1e-2, rtol=1e-2)

    print("KERNEL_OK")
</pallas_src>

<mosaic_0001>
module attributes {stable_mosaic.version = 11 : i64} {
  func.func @_regressor_kernel(%arg0: i32, %arg1: memref<8x22xbf16, #tpu.memory_space<vmem>>, %arg2: memref<22x11xbf16, #tpu.memory_space<vmem>>, %arg3: memref<1x11xf32, #tpu.memory_space<vmem>>, %arg4: memref<11x2xf32, #tpu.memory_space<vmem>>, %arg5: memref<1x2xf32, #tpu.memory_space<vmem>>, %arg6: memref<8x2xf32, #tpu.memory_space<vmem>>) attributes {dimension_semantics = [#tpu.dimension_semantics<parallel>], iteration_bounds = array<i64: 1>, scalar_prefetch = 0 : i64, scratch_operands = 0 : i64, tpu.core_type = #tpu.core_type<tc>, window_params = [{transform_indices = @transform_0, window_bounds = array<i64: 8, 22>}, {pipeline_mode = #tpu.pipeline_mode<synchronous>, transform_indices = @transform_1, window_bounds = array<i64: 22, 11>}, {pipeline_mode = #tpu.pipeline_mode<synchronous>, transform_indices = @transform_2, window_bounds = array<i64: 1, 11>}, {pipeline_mode = #tpu.pipeline_mode<synchronous>, transform_indices = @transform_3, window_bounds = array<i64: 11, 2>}, {pipeline_mode = #tpu.pipeline_mode<synchronous>, transform_indices = @transform_4, window_bounds = array<i64: 1, 2>}, {transform_indices = @transform_5, window_bounds = array<i64: 8, 2>}]} {
    %c0 = arith.constant 0 : index
    %c0_0 = arith.constant 0 : index
    %0 = vector.load %arg1[%c0, %c0_0] : memref<8x22xbf16, #tpu.memory_space<vmem>>, vector<8x22xbf16>
    %c0_1 = arith.constant 0 : index
    %c0_2 = arith.constant 0 : index
    %1 = vector.load %arg2[%c0_1, %c0_2] : memref<22x11xbf16, #tpu.memory_space<vmem>>, vector<22x11xbf16>
    %cst = arith.constant dense<0.000000e+00> : vector<8x11xf32>
    %2 = tpu.matmul %0, %1, %cst {dimension_numbers = #tpu.dot_dimension_numbers<[1], [0], [0], [1], [0, 0, 1, 1], [], []>} : vector<8x22xbf16>, vector<22x11xbf16>, vector<8x11xf32> -> vector<8x11xf32>
    %c0_3 = arith.constant 0 : index
    %c0_4 = arith.constant 0 : index
    %3 = vector.load %arg3[%c0_3, %c0_4] : memref<1x11xf32, #tpu.memory_space<vmem>>, vector<1x11xf32>
    %4 = vector.broadcast %3 : vector<1x11xf32> to vector<8x11xf32>
    %5 = arith.addf %2, %4 : vector<8x11xf32>
    %cst_5 = arith.constant 0.000000e+00 : f32
    %6 = vector.broadcast %cst_5 : f32 to vector<8x11xf32>
    %7 = arith.subf %6, %5 : vector<8x11xf32>
    %8 = math.exp %7 : vector<8x11xf32>
    %cst_6 = arith.constant 1.000000e+00 : f32
    %9 = vector.broadcast %cst_6 : f32 to vector<8x11xf32>
    %10 = arith.addf %9, %8 : vector<8x11xf32>
    %11 = tpu.reciprocal %10 {approx = true} : vector<8x11xf32> -> vector<8x11xf32>
    %c0_7 = arith.constant 0 : index
    %c0_8 = arith.constant 0 : index
    %12 = vector.load %arg4[%c0_7, %c0_8] : memref<11x2xf32, #tpu.memory_space<vmem>>, vector<11x2xf32>
    %cst_9 = arith.constant dense<0.000000e+00> : vector<8x2xf32>
    %13 = tpu.matmul %11, %12, %cst_9 {dimension_numbers = #tpu.dot_dimension_numbers<[1], [0], [0], [1], [0, 0, 1, 1], [], []>} : vector<8x11xf32>, vector<11x2xf32>, vector<8x2xf32> -> vector<8x2xf32>
    %c0_10 = arith.constant 0 : index
    %c0_11 = arith.constant 0 : index
    %14 = vector.load %arg5[%c0_10, %c0_11] : memref<1x2xf32, #tpu.memory_space<vmem>>, vector<1x2xf32>
    %15 = vector.broadcast %14 : vector<1x2xf32> to vector<8x2xf32>
    %16 = arith.addf %13, %15 : vector<8x2xf32>
    %cst_12 = arith.constant 0.000000e+00 : f32
    %17 = vector.broadcast %cst_12 : f32 to vector<8x2xf32>
    %18 = arith.cmpf oge, %16, %17 : vector<8x2xf32>
    %cst_13 = arith.constant 9.99999974E-5 : f32
    %19 = vector.broadcast %cst_13 : f32 to vector<8x2xf32>
    %20 = arith.mulf %19, %16 : vector<8x2xf32>
    %21 = arith.select %18, %16, %20 : vector<8x2xi1>, vector<8x2xf32>
    %c0_14 = arith.constant 0 : index
    %c0_15 = arith.constant 0 : index
    %22 = vector.load %arg6[%c0_14, %c0_15] : memref<8x2xf32, #tpu.memory_space<vmem>>, vector<8x2xf32>
    tpu.vector_store %arg6[%c0_14, %c0_15], %21 {strides = array<i32>} : memref<8x2xf32, #tpu.memory_space<vmem>>, vector<8x2xf32>,
    return
  }
  func.func @transform_0(%arg0: i32) -> (i32, i32) {
    %c0_i32 = arith.constant 0 : i32
    %c0_i32_0 = arith.constant 0 : i32
    return %arg0, %c0_i32 : i32, i32
  }
  func.func @transform_1(%arg0: i32) -> (i32, i32) {
    %c0_i32 = arith.constant 0 : i32
    %c0_i32_0 = arith.constant 0 : i32
    %c0_i32_1 = arith.constant 0 : i32
    return %c0_i32, %c0_i32_0 : i32, i32
  }
  func.func @transform_2(%arg0: i32) -> (i32, i32) {
    %c0_i32 = arith.constant 0 : i32
    %c0_i32_0 = arith.constant 0 : i32
    %c0_i32_1 = arith.constant 0 : i32
    return %c0_i32, %c0_i32_0 : i32, i32
  }
  func.func @transform_3(%arg0: i32) -> (i32, i32) {
    %c0_i32 = arith.constant 0 : i32
    %c0_i32_0 = arith.constant 0 : i32
    %c0_i32_1 = arith.constant 0 : i32
    return %c0_i32, %c0_i32_0 : i32, i32
  }
  func.func @transform_4(%arg0: i32) -> (i32, i32) {
    %c0_i32 = arith.constant 0 : i32
    %c0_i32_0 = arith.constant 0 : i32
    %c0_i32_1 = arith.constant 0 : i32
    return %c0_i32, %c0_i32_0 : i32, i32
  }
  func.func @transform_5(%arg0: i32) -> (i32, i32) {
    %c0_i32 = arith.constant 0 : i32
    %c0_i32_0 = arith.constant 0 : i32
    return %arg0, %c0_i32 : i32, i32
  }
}

</mosaic_0001>

<bundles_post_ra>
// kernel: tpu_custom_call.1
= control target key start
LH: loop header
LB: loop body
LE: loop exit
PB: predicated region body
PF: predicated region fallthrough
CT: control target
= control target key end

     0   :  { %vm45_vm0 = vcmask 1042432   ;;  %v225_v0 = vmov 0.0   ;;  %vm226_vm1 = vmmov 0   ;;  %vm41_vm2 = vcmask 179200   ;;  %s283_s1 = inlined_call_operand.vmem [shape: bf16[22,11], index: 1, kind: input, shape index: {}]   ;;  %s284_s0 = inlined_call_operand.vmem [shape: bf16[8,22], index: 0, kind: input, shape index: {}]   ;;  %s285_s3 = inlined_call_operand.vmem [shape: f32[11,2], index: 3, kind: input, shape index: {}]   ;;  %s286_s2 = inlined_call_operand.vmem [shape: f32[1,11], index: 2, kind: input, shape index: {}]   ;;  %s287_s4 = inlined_call_operand.vmem [shape: f32[1,2], index: 4, kind: input, shape index: {}]   ;;  %s288_s5 = inlined_call_operand.vmem [shape: f32[8,2], index: 5, kind: output, shape index: {}]  }
   0x1   :  { %202 = vmatprep.subr.bf16.mxu0 %v225_v0  ;;  %v219_v1 = vld [vmem:[%s283_s1 + $0x8] ss:$0 sps:$4 sm:$0x77]   ;;  %206 = vmatprep.mubr.msk.bf16.mxu0 %vm226_vm1, %v225_v0  ;;  %v220_v3 = vld [vmem:[%s283_s1] sm:$0xff]   ;;  %vm103_vm3 = vcmask 89088   ;;  %vm183_vm5 = vcmask 15360  }
   0x2   :  { %210 = vmatprep.subr.mxu1 %v225_v0  ;;  %214 = vmatprep.mubr.msk.f32.mxu1 %vm226_vm1, %v225_v0  ;;  %v47_v2 = vsel %vm45_vm0, %v219_v1, 0  ;;  %v21_v4 = vld [vmem:[%s284_s0] sm:$0xf]  ;;  %v95_v5 = vld [vmem:[%s285_s3 + $0x8] sm:$0x7] }
   0x3   :  { %203 = vmatpush3.bf16.msra.mxu0 %v47_v2  ;;  %v94_v6 = vld [vmem:[%s285_s3] sm:$0xff]  ;;  %211 = vmatpush3.msk.msra.mxu1 %vm45_vm0, %v95_v5 }
   0x4   :  { %204 = vmatprep.subr.bf16.mxu0 %v225_v0  ;;  %212 = vmatprep.subr.mxu1 %v225_v0  ;;  %v189_v7 = vld [vmem:[%s286_s2] ss:$0 sm:$0xff] }
   0x5   :  { %213 = vmatpush3.msra.mxu1 %v94_v6  ;;  %v193_v18 = vld [vmem:[%s287_s4] ss:$0 sm:$0xff] }
   0x7   :  { %205 = vmatpush3.bf16.msra.mxu0 %v220_v3 }
   0xa   :  { %207 = vmatmul.mubr.msk.bf16.vlgmr.msra.gmra.mxu0 %vm41_vm2, %v21_v4 }
  0xca   :  { %v83_v8 = vpop.f32.mrf.mxu0 }
  0xcb   :  { %v84_v9 = vadd.f32 %v189_v7, %v83_v8 }
  0xcc   :  { %v208_v10 = vpop.f32.mrf.mxu0 }
  0xcd   :  { %v89_v11 = vsub.f32 0.0, %v84_v9 }
  0xce   :  { %v86_v12 = vpop.f32.mrf.mxu0 }
  0xcf   :  { %v90_v13 = vmul.f32 1.442695, %v89_v11 }
  0xd0   :  { %v209_v14 = vpop.f32.mrf.mxu0 }
  0xd1   :  { %221 = vpow2.f32 %v90_v13 }
  0xde   :  { %v222_v15 = vpop.eup %221 }
  0xdf   :  { %v92_v16 = vadd.f32 1.0, %v222_v15 }
  0xe1   :  { %223 = vrcp.f32 %v92_v16 }
  0xee   :  { %v224_v17 = vpop.eup %223 }
  0xef   :  { %215 = vmatmul.mubr.msk.f32.vlgmr.msra.gmra.mxu1 %vm103_vm3, %v224_v17 }
 0x1af   :  { %v176_v19 = vpop.f32.mrf.mxu1 }
 0x1b0   :  { %v177_v20 = vadd.f32 %v193_v18, %v176_v19 }
 0x1b1   :  { %v216_v21 = vpop.f32.mrf.mxu1 }
 0x1b2   :  { %vm180_vm4 = vcmp.ge.f32.partialorder %v177_v20, 0.0  ;;  %v181_v22 = vmul.f32 0.0001, %v177_v20 }
 0x1b4   :  { %v182_v23 = vsel %vm180_vm4, %v177_v20, %v181_v22 }
 0x1b5   :  { %184 = vst.msk [vmem:[%s288_s5] sm:$0xff] %vm183_vm5, %v182_v23 }

</bundles_post_ra>
